<compile_context>
chip_gen: v6e
topology: v6e:2x2x1
jax: 0.10.0
libtpu: 0.0.40
codegen_flags: <defaults>
</compile_context>

<pallas_src>
import jax
import jax.numpy as jnp
from jax.experimental import pallas as pl
from jax.experimental.pallas import tpu as pltpu


def _bce_easy_kernel(x01_ref, x89_ref, t_ref, out_ref):
    """One (p, i) grid step.

    x01_ref: (B, 2, T, L)  channels 0:2 of the current spatial tile
    x89_ref: (B, 2, T, L)  channels 8:10 of the current spatial tile
    t_ref:   (B, T, L)     targets for the current spatial tile
    out_ref: (1, 8, L)     per-parallel-slice partial lane sums (row 0 used);
                           resident accumulator across the "arbitrary" axis.
    """
    i = pl.program_id(1)

    @pl.when(i == 0)
    def _():
        out_ref[...] = jnp.zeros_like(out_ref)

    x01 = x01_ref[...]
    x89 = x89_ref[...]
    # Channel gather + sum (adds in the input dtype, upcast once for the math).
    z = (x01[:, 0] + x01[:, 1] + x89[:, 0] + x89[:, 1]).astype(jnp.float32)
    t = t_ref[...].astype(jnp.float32)

    # Logits-form BCE:  log sigmoid(z) = min(z,0) - softplus(-|z|)
    #                   log(1-sigmoid(z)) = min(-z,0) - softplus(-|z|)
    # Keep PyTorch's -100 clamp on both log terms.
    s = jnp.log(1.0 + jnp.exp(-jnp.abs(z)))                     # softplus(-|z|)
    log_p = jnp.maximum(jnp.minimum(z, 0.0) - s, -100.0)
    log_1mp = jnp.maximum(jnp.minimum(-z, 0.0) - s, -100.0)
    per_elem = -(t * log_p + (1.0 - t) * log_1mp)               # (B, T, L)

    # Raw per-lane partial sums; the single divide-by-N happens in the wrapper.
    psum = jnp.sum(jnp.sum(per_elem, axis=0), axis=0, keepdims=True)   # (1, L)
    out_ref[0:1, 0:1, :] = out_ref[0:1, 0:1, :] + psum[None]


def _choose_rows_per_block(num_rows, step_bytes_per_row, vmem_budget_bytes):
    """Largest multiple-of-8 divisor of num_rows whose per-step footprint fits."""
    cap = max(8, vmem_budget_bytes // max(step_bytes_per_row, 1))
    cap = (cap // 8) * 8
    best = None
    for t in range(8, min(num_rows, cap) + 1, 8):
        if num_rows % t == 0:
            best = t
    if best is None:
        best = num_rows          # full-extent block is always a legal block shape
    return best


def binary_cross_entropy_easy(outputs, targets, *, block_rows=None):
    """outputs: [B, C, H, W] (C >= 10); targets: [B, H, W]. Returns scalar f32 loss."""
    B, C, H, W = outputs.shape
    assert C >= 10, "need channels 0, 1, 8, 9"
    assert targets.shape == (B, H, W)
    hw = H * W

    # Lane-dense layout: fold H*W as (rows, 128) when possible (free reshape of a
    # contiguous array); otherwise keep (H, W) and use full-extent tiled dims.
    lanes = 128 if hw % 128 == 0 else W
    rows = hw // lanes
    x = outputs.reshape(B, C, rows, lanes)
    t = targets.reshape(B, rows, lanes)

    # Per-step VMEM bytes per spatial row: 2 channel-pair blocks + target block,
    # double-buffered by the BlockSpec pipeline.
    out_item = jnp.dtype(outputs.dtype).itemsize
    tgt_item = jnp.dtype(targets.dtype).itemsize
    bytes_per_row = 2 * (B * 2 * lanes * out_item) + B * lanes * tgt_item
    vmem_budget = 8 * 1024 * 1024        # keep well under v7x's 64 MiB physical VMEM
    if block_rows is None:
        block_rows = _choose_rows_per_block(rows, 2 * bytes_per_row, vmem_budget)
    assert rows % block_rows == 0, (rows, block_rows)
    n_tiles = rows // block_rows

    # Split the reduction range across 2 TensorCores (v7x) when it divides evenly;
    # on single-core chips the "parallel" axis simply runs sequentially.
    n_par = 2 if (n_tiles >= 2 and n_tiles % 2 == 0) else 1
    n_seq = n_tiles // n_par

    x01_map = lambda p, i: (0, 0, p * n_seq + i, 0)   # channel block 0 -> channels 0:2
    x89_map = lambda p, i: (0, 4, p * n_seq + i, 0)   # channel block 4 -> channels 8:10
    t_map = lambda p, i: (0, p * n_seq + i, 0)

    partials = pl.pallas_call(
        _bce_easy_kernel,
        out_shape=jax.ShapeDtypeStruct((n_par, 8, lanes), jnp.float32),
        grid=(n_par, n_seq),
        in_specs=[
            pl.BlockSpec((B, 2, block_rows, lanes), x01_map),
            pl.BlockSpec((B, 2, block_rows, lanes), x89_map),
            pl.BlockSpec((B, block_rows, lanes), t_map),
        ],
        out_specs=pl.BlockSpec((1, 8, lanes), lambda p, i: (p, 0, 0)),
        compiler_params=pltpu.CompilerParams(
            dimension_semantics=("parallel", "arbitrary"),
            vmem_limit_bytes=32 * 1024 * 1024,
        ),
    )(x, x, t)

    # Final cross-lane / cross-core reduction and the single mean divide.
    return jnp.sum(partials) / jnp.float32(B * hw)


def _reference(outputs, targets):
    z = (outputs[:, 0] + outputs[:, 1] + outputs[:, 8] + outputs[:, 9]).astype(jnp.float32)
    p = jax.nn.sigmoid(z)
    t = targets.astype(jnp.float32)
    return jnp.mean(-(t * jnp.maximum(jnp.log(p), -100.0)
                      + (1.0 - t) * jnp.maximum(jnp.log(1.0 - p), -100.0)))


if __name__ == "__main__":
    key = jax.random.PRNGKey(0)
    k1, k2, k3, k4 = jax.random.split(key, 4)

    # Small shape (C must be >= 10 for channels 8 and 9): single grid step.
    B, C, H, W = 2, 16, 16, 16
    outputs = jax.random.normal(k1, (B, C, H, W), dtype=jnp.float32)
    targets = jax.random.uniform(k2, (B, H, W), dtype=jnp.float32)   # soft labels in [0,1]
    loss = binary_cross_entropy_easy(outputs, targets)
    jax.block_until_ready(loss)
    ref = _reference(outputs, targets)
    assert jnp.allclose(loss, ref, atol=1e-5, rtol=1e-5), (loss, ref)

    # Larger spatial shape exercising the tiled grid + 2-way parallel split (grid (2, 2)).
    B2, C2, H2, W2 = 2, 16, 64, 64
    outputs2 = jax.random.normal(k3, (B2, C2, H2, W2), dtype=jnp.float32)
    targets2 = jax.random.uniform(k4, (B2, H2, W2), dtype=jnp.float32)
    loss2 = binary_cross_entropy_easy(outputs2, targets2, block_rows=8)
    jax.block_until_ready(loss2)
    ref2 = _reference(outputs2, targets2)
    assert jnp.allclose(loss2, ref2, atol=1e-5, rtol=1e-5), (loss2, ref2)

    print("KERNEL_OK")
</pallas_src>

<mosaic_0001>
module attributes {stable_mosaic.version = 11 : i64} {
  func.func @_bce_easy_kernel(%arg0: i32, %arg1: i32, %arg2: memref<2x2x2x128xf32, #tpu.memory_space<vmem>>, %arg3: memref<2x2x2x128xf32, #tpu.memory_space<vmem>>, %arg4: memref<2x2x128xf32, #tpu.memory_space<vmem>>, %arg5: memref<1x8x128xf32, #tpu.memory_space<vmem>>) attributes {dimension_semantics = [#tpu.dimension_semantics<parallel>, #tpu.dimension_semantics<arbitrary>], iteration_bounds = array<i64: 1, 1>, scalar_prefetch = 0 : i64, scratch_operands = 0 : i64, tpu.core_type = #tpu.core_type<tc>, window_params = [{transform_indices = @transform_0, window_bounds = array<i64: 2, 2, 2, 128>}, {transform_indices = @transform_1, window_bounds = array<i64: 2, 2, 2, 128>}, {transform_indices = @transform_2, window_bounds = array<i64: 2, 2, 128>}, {transform_indices = @transform_3, window_bounds = array<i64: 1, 8, 128>}]} {
    %c0_i32 = arith.constant 0 : i32
    %0 = arith.cmpi eq, %arg1, %c0_i32 : i32
    %1 = arith.extui %0 : i1 to i32
    %c0_i32_0 = arith.constant 0 : i32
    %2 = arith.cmpi ne, %1, %c0_i32_0 : i32
    scf.if %2 {
      %cst_27 = arith.constant 0.000000e+00 : f32
      %50 = vector.broadcast %cst_27 : f32 to vector<1x8x128xf32>
      %c0_28 = arith.constant 0 : index
      %c0_29 = arith.constant 0 : index
      %c0_30 = arith.constant 0 : index
      %51 = vector.load %arg5[%c0_28, %c0_29, %c0_30] : memref<1x8x128xf32, #tpu.memory_space<vmem>>, vector<1x8x128xf32>
      tpu.vector_store %arg5[%c0_28, %c0_29, %c0_30], %50 {strides = array<i32>} : memref<1x8x128xf32, #tpu.memory_space<vmem>>, vector<1x8x128xf32>,
    } else {
    }
    %c0 = arith.constant 0 : index
    %c0_1 = arith.constant 0 : index
    %c0_2 = arith.constant 0 : index
    %c0_3 = arith.constant 0 : index
    %3 = vector.load %arg2[%c0, %c0_1, %c0_2, %c0_3] : memref<2x2x2x128xf32, #tpu.memory_space<vmem>>, vector<2x2x2x128xf32>
    %c0_4 = arith.constant 0 : index
    %c0_5 = arith.constant 0 : index
    %c0_6 = arith.constant 0 : index
    %c0_7 = arith.constant 0 : index
    %4 = vector.load %arg3[%c0_4, %c0_5, %c0_6, %c0_7] : memref<2x2x2x128xf32, #tpu.memory_space<vmem>>, vector<2x2x2x128xf32>
    %5 = vector.extract_strided_slice %3 {offsets = [0, 0, 0, 0], sizes = [2, 1, 2, 128], strides = [1, 1, 1, 1]} : vector<2x2x2x128xf32> to vector<2x1x2x128xf32>
    %6 = vector.shape_cast %5 : vector<2x1x2x128xf32> to vector<2x2x128xf32>
    %7 = vector.extract_strided_slice %3 {offsets = [0, 1, 0, 0], sizes = [2, 1, 2, 128], strides = [1, 1, 1, 1]} : vector<2x2x2x128xf32> to vector<2x1x2x128xf32>
    %8 = vector.shape_cast %7 : vector<2x1x2x128xf32> to vector<2x2x128xf32>
    %9 = arith.addf %6, %8 : vector<2x2x128xf32>
    %10 = vector.extract_strided_slice %4 {offsets = [0, 0, 0, 0], sizes = [2, 1, 2, 128], strides = [1, 1, 1, 1]} : vector<2x2x2x128xf32> to vector<2x1x2x128xf32>
    %11 = vector.shape_cast %10 : vector<2x1x2x128xf32> to vector<2x2x128xf32>
    %12 = arith.addf %9, %11 : vector<2x2x128xf32>
    %13 = vector.extract_strided_slice %4 {offsets = [0, 1, 0, 0], sizes = [2, 1, 2, 128], strides = [1, 1, 1, 1]} : vector<2x2x2x128xf32> to vector<2x1x2x128xf32>
    %14 = vector.shape_cast %13 : vector<2x1x2x128xf32> to vector<2x2x128xf32>
    %15 = arith.addf %12, %14 : vector<2x2x128xf32>
    %c0_8 = arith.constant 0 : index
    %c0_9 = arith.constant 0 : index
    %c0_10 = arith.constant 0 : index
    %16 = vector.load %arg4[%c0_8, %c0_9, %c0_10] : memref<2x2x128xf32, #tpu.memory_space<vmem>>, vector<2x2x128xf32>
    %17 = math.absf %15 : vector<2x2x128xf32>
    %cst = arith.constant 0.000000e+00 : f32
    %18 = vector.broadcast %cst : f32 to vector<2x2x128xf32>
    %19 = arith.subf %18, %17 : vector<2x2x128xf32>
    %20 = math.exp %19 : vector<2x2x128xf32>
    %cst_11 = arith.constant 1.000000e+00 : f32
    %21 = vector.broadcast %cst_11 : f32 to vector<2x2x128xf32>
    %22 = arith.addf %21, %20 : vector<2x2x128xf32>
    %23 = math.log %22 : vector<2x2x128xf32>
    %cst_12 = arith.constant 0.000000e+00 : f32
    %24 = vector.broadcast %cst_12 : f32 to vector<2x2x128xf32>
    %25 = arith.minimumf %15, %24 : vector<2x2x128xf32>
    %26 = arith.subf %25, %23 : vector<2x2x128xf32>
    %cst_13 = arith.constant -1.000000e+02 : f32
    %27 = vector.broadcast %cst_13 : f32 to vector<2x2x128xf32>
    %28 = arith.maximumf %26, %27 : vector<2x2x128xf32>
    %cst_14 = arith.constant 0.000000e+00 : f32
    %29 = vector.broadcast %cst_14 : f32 to vector<2x2x128xf32>
    %30 = arith.subf %29, %15 : vector<2x2x128xf32>
    %cst_15 = arith.constant 0.000000e+00 : f32
    %31 = vector.broadcast %cst_15 : f32 to vector<2x2x128xf32>
    %32 = arith.minimumf %30, %31 : vector<2x2x128xf32>
    %33 = arith.subf %32, %23 : vector<2x2x128xf32>
    %cst_16 = arith.constant -1.000000e+02 : f32
    %34 = vector.broadcast %cst_16 : f32 to vector<2x2x128xf32>
    %35 = arith.maximumf %33, %34 : vector<2x2x128xf32>
    %36 = arith.mulf %16, %28 : vector<2x2x128xf32>
    %cst_17 = arith.constant 1.000000e+00 : f32
    %37 = vector.broadcast %cst_17 : f32 to vector<2x2x128xf32>
    %38 = arith.subf %37, %16 : vector<2x2x128xf32>
    %39 = arith.mulf %38, %35 : vector<2x2x128xf32>
    %40 = arith.addf %36, %39 : vector<2x2x128xf32>
    %cst_18 = arith.constant 0.000000e+00 : f32
    %41 = vector.broadcast %cst_18 : f32 to vector<2x2x128xf32>
    %42 = arith.subf %41, %40 : vector<2x2x128xf32>
    %cst_19 = arith.constant dense<0.000000e+00> : vector<2x128xf32>
    %43 = vector.multi_reduction <add>, %42, %cst_19 [0] : vector<2x2x128xf32> to vector<2x128xf32>
    %cst_20 = arith.constant dense<0.000000e+00> : vector<128xf32>
    %44 = vector.multi_reduction <add>, %43, %cst_20 [0] : vector<2x128xf32> to vector<128xf32>
    %45 = vector.shape_cast %44 : vector<128xf32> to vector<1x128xf32>
    %c0_21 = arith.constant 0 : index
    %c0_22 = arith.constant 0 : index
    %c0_23 = arith.constant 0 : index
    %46 = vector.load %arg5[%c0_21, %c0_22, %c0_23] : memref<1x8x128xf32, #tpu.memory_space<vmem>>, vector<1x1x128xf32>
    %47 = vector.shape_cast %45 : vector<1x128xf32> to vector<1x1x128xf32>
    %48 = arith.addf %46, %47 : vector<1x1x128xf32>
    %c0_24 = arith.constant 0 : index
    %c0_25 = arith.constant 0 : index
    %c0_26 = arith.constant 0 : index
    %49 = vector.load %arg5[%c0_24, %c0_25, %c0_26] : memref<1x8x128xf32, #tpu.memory_space<vmem>>, vector<1x1x128xf32>
    tpu.vector_store %arg5[%c0_24, %c0_25, %c0_26], %48 {strides = array<i32>} : memref<1x8x128xf32, #tpu.memory_space<vmem>>, vector<1x1x128xf32>,
    return
  }
  func.func @transform_0(%arg0: i32, %arg1: i32) -> (i32, i32, i32, i32) {
    %c1_i32 = arith.constant 1 : i32
    %0 = arith.muli %arg0, %c1_i32 : i32
    %1 = arith.addi %0, %arg1 : i32
    %c0_i32 = arith.constant 0 : i32
    %c0_i32_0 = arith.constant 0 : i32
    %c0_i32_1 = arith.constant 0 : i32
    %c0_i32_2 = arith.constant 0 : i32
    return %c0_i32, %c0_i32_0, %1, %c0_i32_1 : i32, i32, i32, i32
  }
  func.func @transform_1(%arg0: i32, %arg1: i32) -> (i32, i32, i32, i32) {
    %c1_i32 = arith.constant 1 : i32
    %0 = arith.muli %arg0, %c1_i32 : i32
    %1 = arith.addi %0, %arg1 : i32
    %c0_i32 = arith.constant 0 : i32
    %c4_i32 = arith.constant 4 : i32
    %c0_i32_0 = arith.constant 0 : i32
    %c0_i32_1 = arith.constant 0 : i32
    return %c0_i32, %c4_i32, %1, %c0_i32_0 : i32, i32, i32, i32
  }
  func.func @transform_2(%arg0: i32, %arg1: i32) -> (i32, i32, i32) {
    %c1_i32 = arith.constant 1 : i32
    %0 = arith.muli %arg0, %c1_i32 : i32
    %1 = arith.addi %0, %arg1 : i32
    %c0_i32 = arith.constant 0 : i32
    %c0_i32_0 = arith.constant 0 : i32
    %c0_i32_1 = arith.constant 0 : i32
    return %c0_i32, %1, %c0_i32_0 : i32, i32, i32
  }
  func.func @transform_3(%arg0: i32, %arg1: i32) -> (i32, i32, i32) {
    %c0_i32 = arith.constant 0 : i32
    %c0_i32_0 = arith.constant 0 : i32
    %c0_i32_1 = arith.constant 0 : i32
    return %arg0, %c0_i32, %c0_i32_0 : i32, i32, i32
  }
}

</mosaic_0001>

<bundles_post_ra>
// kernel: tpu_custom_call.1
= control target key start
LH: loop header
LB: loop body
LE: loop exit
PB: predicated region body
PF: predicated region fallthrough
CT: control target
= control target key end

     0   :  { %8 = vsyncpa [#allocation3], 0  ;;  %s337_s0 = inlined_call_operand.hbm [shape: f32[2,16,2,128], index: 0, kind: input, shape index: {}]   ;;  %s338_s1 = inlined_call_operand.hbm [shape: f32[2,16,2,128], index: 1, kind: input, shape index: {}]   ;;  %s339_s2 = inlined_call_operand.hbm [shape: f32[2,2,128], index: 2, kind: input, shape index: {}]   ;;  %s340_s3 = inlined_call_operand.hbm [shape: f32[1,8,128], index: 3, kind: output, shape index: {}]  }
   0x1   :  { %9 = vsyncpa [#allocation6], 0 }
   0x2   :  { %10 = vsyncpa [#allocation4], 0 }
   0x3   :  { %s23_s12 = sld [smem:[#allocation0]]   ;;  %s286_s13 = smov [#allocation2]  }
   0x4   :  { %s31_s14 = sshll.u32 %s286_s13, 4  ;;  %s287_s15 = smov 512   ;;  %s32_s14 = int_to_ptr.vmem [resolvable:$true] %s31_s14 }
   0x5   :  { %38 = sst [smem:[#allocation10]] %s287_s15  ;;  %s288_s16 = smov 64  }
   0x6   :  { %40 = sst [smem:[#allocation10 + $0x1]] %s288_s16  ;;  %s289_s17 = smov 2  }
   0x7   :  { %42 = sst [smem:[#allocation10 + $0x2]] %s289_s17  ;;  %s290_s19 = smov 32  }
   0x8   :  { %44 = sst [smem:[#allocation10 + $0x3]] %s290_s19  ;;  %s291_s21 = smov [#allocation3]  }
   0x9   :  { %s209_s18 = sshll.u32 %s23_s12, 26  ;;  %46 = sst [smem:[#allocation10 + $0x4]] %s290_s19 }
   0xa   :  { %s210_s20 = sadd.s32 134217728, %s209_s18  ;;  %48 = sst [smem:[#allocation10 + $0x5]] %s289_s17 }
   0xb   :  { %s292_s22 = smov 131072  }
   0xc   :  { %50 = dma.general %s337_s0, 128, %s32_s14, %s291_s21, %s292_s22, [#allocation10], %s210_s20, 0  }
   0xd   :  { %s208_s27 = scalar_lea.hbm %s338_s1, 256  ;;  %s64_s28 = sld [smem:[#allocation0]]  }
   0xe   :  { %s293_s29 = smov [#allocation5]   ;;  %s294_s4 = smov 512  }
   0xf   :  { %s72_s30 = sshll.u32 %s293_s29, 4  ;;  %79 = sst [smem:[#allocation12]] %s294_s4  ;;  %s73_s30 = int_to_ptr.vmem [resolvable:$true] %s72_s30 }
  0x10   :  { %s295_s5 = smov 64   ;;  %s296_s6 = smov 2  }
  0x11   :  { %81 = sst [smem:[#allocation12 + $0x1]] %s295_s5  ;;  %s297_s8 = smov 32  }
  0x12   :  { %83 = sst [smem:[#allocation12 + $0x2]] %s296_s6  ;;  %s298_s0 = smov [#allocation6]  }
  0x13   :  { %s211_s7 = sshll.u32 %s64_s28, 26  ;;  %85 = sst [smem:[#allocation12 + $0x3]] %s297_s8 }
  0x14   :  { %s212_s9 = sadd.s32 134217728, %s211_s7  ;;  %87 = sst [smem:[#allocation12 + $0x4]] %s297_s8 }
  0x15   :  { %89 = sst [smem:[#allocation12 + $0x5]] %s296_s6  ;;  %s299_s10 = smov 131072  }
  0x16   :  { %91 = dma.general %s208_s27, 128, %s73_s30, %s298_s0, %s299_s10, [#allocation12], %s212_s9, 0  }
  0x17   :  { %s300_s1 = smov [#allocation7]  }
  0x18   :  { %s100_s11 = sshll.u32 %s300_s1, 4  ;;  %s101_s11 = int_to_ptr.vmem [resolvable:$true] %s100_s11 }
  0x19   :  { %s248_s12 = scalar_lea.vmem %s101_s11, 64  ;;  %p253_p1 = scmp.lt.s32.totalorder %s101_s11, %s101_s11 }
  0x1a   :  { %p249_p0 = scmp.ne.s32.totalorder %s101_s11, %s248_s12  ;;  %p254_p2 = scmp.lt.s32.totalorder %s248_s12, %s248_s12 }
  0x1c   :  { %p255_p3 = por %p254_p2, %p253_p1 }
  0x1e   :  { %p256_p4 = pnand %p255_p3, %p249_p0 }
  0x20   :  { %259 = shalt.err (!%p256_p4)
}
  0x21   :  { %s301_s13 = smov 32   ;;  %s302_s14 = smov 2  }
  0x22   :  { %106 = dma.hbm_to_vmem [thread:$0]  %s339_s2, 64, %s101_s11, [#allocation6], %s301_s13, %s301_s13, %s302_s14  }
  0x23   :  { %280 = dma.done.wait [#allocation3], 128  }
  0x24   :  { %281 = vsyncadd [#allocation3], 4294967168 }
  0x25   :  { %282 = dma.done.wait [#allocation6], 192  }
  0x26   :  { %283 = vsyncadd [#allocation6], 4294967104  ;;  %v303_v0 = vmov 0.0   ;;  %v124_v1 = vld [vmem:[#allocation2] sm:$0x3]  ;;  %vm178_vm0 = vcmask 1041408  }
  0x27   :  { %123 = vst [vmem:[#allocation8] sm:$0xff] %v303_v0  ;;  %v125_v2 = vld [vmem:[#allocation2 + $0x2] sm:$0x3]  ;;  %v126_v3 = vld [vmem:[#allocation2 + $0x4] sm:$0x3]  ;;  %s304_s2 = smov [#allocation8]  }
  0x28   :  { %v127_v4 = vld [vmem:[#allocation2 + $0x6] sm:$0x3]  ;;  %v128_v5 = vld [vmem:[#allocation5] sm:$0x3]  ;;  %v132_v6 = vadd.f32 %v125_v2, %v124_v1  ;;  %v129_v7 = vld [vmem:[#allocation5 + $0x2] sm:$0x3] }
  0x29   :  { %v130_v8 = vld [vmem:[#allocation5 + $0x4] sm:$0x3]  ;;  %v133_v9 = vadd.f32 %v127_v4, %v126_v3  ;;  %v131_v10 = vld [vmem:[#allocation5 + $0x6] sm:$0x3]  ;;  %v138_v30 = vld [vmem:[#allocation7] sm:$0x3] }
  0x2a   :  { %v134_v11 = vadd.f32 %v132_v6, %v128_v5  ;;  %v139_v34 = vld [vmem:[#allocation7 + $0x2] sm:$0x3]  ;;  %v170_v39 = vsub.f32 1.0, %v138_v30  ;;  %s198_s17 = sshll.u32 %s304_s2, 4  ;;  %s199_s17 = int_to_ptr.vmem [resolvable:$true] %s198_s17 }
  0x2b   :  { %v135_v12 = vadd.f32 %v133_v9, %v130_v8  ;;  %v171_v42 = vsub.f32 1.0, %v139_v34  ;;  %s260_s18 = scalar_lea.vmem %s199_s17, 128  ;;  %p265_p6 = scmp.lt.s32.totalorder %s199_s17, %s199_s17 }
  0x2c   :  { %v136_v13 = vadd.f32 %v134_v11, %v129_v7  ;;  %p261_p5 = scmp.ne.s32.totalorder %s199_s17, %s260_s18  ;;  %p266_p7 = scmp.lt.s32.totalorder %s260_s18, %s260_s18 }
  0x2d   :  { %v137_v14 = vadd.f32 %v135_v12, %v131_v10 }
  0x2e   :  { %v140_v15 = vand.u32 2147483647, %v136_v13  ;;  %v160_v25 = vsub.f32 0.0, %v136_v13  ;;  %v154_v27 = vmin.f32 %v136_v13, 0.0  ;;  %v189_v0 = vld [vmem:[#allocation8] sm:$0x1]  ;;  %p267_p8 = por %p266_p7, %p265_p6 }
  0x2f   :  { %v141_v16 = vand.u32 2147483647, %v137_v14  ;;  %v161_v26 = vsub.f32 0.0, %v137_v14  ;;  %v155_v31 = vmin.f32 %v137_v14, 0.0 }
  0x30   :  { %v142_v17 = vsub.f32 0.0, %v140_v15  ;;  %v162_v28 = vmin.f32 %v160_v25, 0.0  ;;  %p268_p9 = pnand %p267_p8, %p261_p5 }
  0x31   :  { %v143_v18 = vsub.f32 0.0, %v141_v16  ;;  %v163_v32 = vmin.f32 %v161_v26, 0.0 }
  0x32   :  { %v144_v19 = vmul.f32 1.442695, %v142_v17 }
  0x33   :  { %v146_v20 = vmul.f32 1.442695, %v143_v18 }
  0x34   :  { %232 = vpow2.f32 %v144_v19 }
  0x35   :  { %234 = vpow2.f32 %v146_v20 }
  0x41   :  { %v233_v21 = vpop.eup %232 }
  0x42   :  { %v235_v22 = vpop.eup %234  ;;  %v148_v23 = vadd.f32 1.0, %v233_v21 }
  0x43   :  { %v149_v24 = vadd.f32 1.0, %v235_v22 }
  0x44   :  { %236 = vlog2.f32 %v148_v23 }
  0x45   :  { %238 = vlog2.f32 %v149_v24 }
  0x51   :  { %v237_v29 = vpop.eup %236 }
  0x52   :  { %v239_v33 = vpop.eup %238  ;;  %v151_v35 = vmul.f32 0.6931472, %v237_v29 }
  0x53   :  { %v153_v36 = vmul.f32 0.6931472, %v239_v33 }
  0x54   :  { %v156_v37 = vsub.f32 %v154_v27, %v151_v35  ;;  %v164_v38 = vsub.f32 %v162_v28, %v151_v35 }
  0x55   :  { %v157_v40 = vsub.f32 %v155_v31, %v153_v36  ;;  %v165_v41 = vsub.f32 %v163_v32, %v153_v36 }
  0x56   :  { %v158_v43 = vmax.f32 %v156_v37, -100.0  ;;  %v166_v44 = vmax.f32 %v164_v38, -100.0 }
  0x57   :  { %v159_v45 = vmax.f32 %v157_v40, -100.0  ;;  %v167_v46 = vmax.f32 %v165_v41, -100.0 }
  0x58   :  { %v168_v47 = vmul.f32 %v158_v43, %v138_v30  ;;  %v172_v48 = vmul.f32 %v170_v39, %v166_v44 }
  0x59   :  { %v169_v49 = vmul.f32 %v159_v45, %v139_v34  ;;  %v173_v50 = vmul.f32 %v171_v42, %v167_v46 }
  0x5a   :  { %v174_v51 = vadd.f32 %v172_v48, %v168_v47 }
  0x5b   :  { %v175_v52 = vadd.f32 %v173_v50, %v169_v49 }
  0x5c   :  { %v176_v53 = vsub.f32 0.0, %v174_v51 }
  0x5d   :  { %v177_v54 = vsub.f32 0.0, %v175_v52 }
  0x5e   :  { %v179_v55 = vsel %vm178_vm0, %v176_v53, 0.0 }
  0x5f   :  { %v180_v56 = vsel %vm178_vm0, %v177_v54, 0.0 }
  0x60   :  { %v181_v57 = vadd.f32 %v180_v56, %v179_v55 }
  0x62   :  { %v182_v58 = vsel %vm178_vm0, %v181_v57, 0.0 }
  0x63   :  { %v183_v59 = vrot.slane %v182_v58, 4 }
  0x65   :  { %v184_v60 = vadd.f32 %v183_v59, %v182_v58 }
  0x67   :  { %v185_v61 = vrot.slane %v184_v60, 2 }
  0x69   :  { %v186_v62 = vadd.f32 %v185_v61, %v184_v60 }
  0x6b   :  { %v187_v63 = vrot.slane %v186_v62, 1 }
  0x6d   :  { %v188_v1 = vadd.f32 %v187_v63, %v186_v62 }
  0x6f   :  { %v190_v2 = vadd.f32 %v189_v0, %v188_v1 }
  0x71   :  { %191 = vst [vmem:[#allocation8] sm:$0x1] %v190_v2 }
  0x72   :  { %271 = shalt.err (!%p268_p9)
}
  0x73   :  { %201 = dma.vmem_to_hbm [thread:$0]  %s199_s17, 128, %s340_s3, [#allocation4]  }
  0x74   :  { %284 = dma.done.wait [#allocation4], 128  }
  0x75   :  { %285 = vsyncadd [#allocation4], 4294967168 }
  0x76   :  { %205 = vsyncpa [#allocation3], 1 }
  0x77   :  { %206 = vsyncpa [#allocation6], 1 }
  0x78   :  { %207 = vsyncpa [#allocation4], 1 }

</bundles_post_ra>
